<compile_context>
chip_gen: v7x
topology: tpu7x:2x2x1
jax: 0.10.0
libtpu: 0.0.40
codegen_flags: <defaults>
</compile_context>

<pallas_src>
import functools

import jax
import jax.numpy as jnp
from jax import lax
from jax.experimental import pallas as pl
from jax.experimental.pallas import tpu as pltpu

# ----------------------------- config ---------------------------------------
SOS_ID = 1
VOCAB_SIZE = 50
TEXT_MAX_LEN = 8          # product_text_max_len
TEXT_FEAT = 24            # text encoder output size
IMAGE_FEAT = 40           # image encoder output size
MM_SIZE = TEXT_FEAT + IMAGE_FEAT          # config.mm_size = 64
CTX_SIZE = 32             # config.context_vector_size == ContextEncoder output
IMAGE_SIZE = 16
BATCH = 2
COS_EPS = 1e-8            # torch cosine_similarity default eps

TB = 8                    # batch tile (sublane-aligned)
OUT_LANES = 128           # lane-dense output slab width


# ------------------------- Pallas kernel (hot path) --------------------------
def _similarity_kernel(ctx_ref, mm_in_ref, w_ref, b_ref, o_ref):
    """Fused: mm = [txt|img] @ W + b ; out = cosine_similarity(ctx, mm, dim=1).

    One K=64 MXU matmul, one fused lane-reduction pass, EUP rsqrt, and a
    lane-dense (TB, 128) unmasked store (wrapper reads column 0).
    """
    # Single matmul on the pre-concatenated multimodal vector (f32 accumulate).
    mm = (
        jnp.dot(mm_in_ref[...], w_ref[...], preferred_element_type=jnp.float32)
        + b_ref[...]
    )                                                       # (TB, CTX)
    ctx = ctx_ref[...]                                      # (TB, CTX)

    # Fuse the three lane reductions (dot, ||ctx||^2, ||mm||^2) into one pass:
    # stack the three elementwise products on the sublane axis, reduce lanes once.
    tb = ctx.shape[0]
    stacked = jnp.concatenate([ctx * mm, ctx * ctx, mm * mm], axis=0)  # (3*TB, CTX)
    sums = jnp.sum(stacked, axis=-1, keepdims=True)                    # (3*TB, 1)

    dot = sums[:tb]
    # torch: dot / (max(||x1||, eps) * max(||x2||, eps))
    #      = dot * rsqrt(max(||x1||^2, eps^2) * max(||x2||^2, eps^2))
    eps2 = jnp.float32(COS_EPS * COS_EPS)
    n_ctx2 = jnp.maximum(sums[tb:2 * tb], eps2)
    n_mm2 = jnp.maximum(sums[2 * tb:], eps2)
    sim = dot * lax.rsqrt(n_ctx2 * n_mm2)                   # (TB, 1), rsqrt on EUP

    # Lane-dense output: broadcast across 128 lanes -> unmasked full-vreg store.
    o_ref[...] = jnp.broadcast_to(sim, o_ref.shape)


@jax.jit
def similarity_head(context, mm_in, w_linear, bias2d):
    """context: (B, CTX), mm_in: (B, MM) pre-concatenated [text|image] features."""
    b = context.shape[0]
    b_pad = ((b + TB - 1) // TB) * TB
    if b_pad != b:
        pad = ((0, b_pad - b), (0, 0))
        context = jnp.pad(context, pad)
        mm_in = jnp.pad(mm_in, pad)

    out = pl.pallas_call(
        _similarity_kernel,
        out_shape=jax.ShapeDtypeStruct((b_pad, OUT_LANES), jnp.float32),
        grid=(b_pad // TB,),
        in_specs=[
            pl.BlockSpec((TB, CTX_SIZE), lambda i: (i, 0)),        # context tile
            pl.BlockSpec((TB, MM_SIZE), lambda i: (i, 0)),         # [txt|img] tile
            pl.BlockSpec((MM_SIZE, CTX_SIZE), lambda i: (0, 0)),   # full weight
            pl.BlockSpec((1, CTX_SIZE), lambda i: (0, 0)),         # bias
        ],
        out_specs=pl.BlockSpec((TB, OUT_LANES), lambda i: (i, 0)),
        compiler_params=pltpu.CompilerParams(
            dimension_semantics=("parallel",),   # batch tiles split across TCs (v7x)
        ),
    )(context, mm_in, w_linear, bias2d)
    return out[:b, 0]  # (batch,) like torch cosine_similarity


# --------------------------- encoder stand-ins (glue) ------------------------
def text_encoder(params, text_with_sos, text_length):
    """Embedding lookup + length-masked mean pooling -> (batch, TEXT_FEAT)."""
    emb = jnp.take(params["embedding"], text_with_sos, axis=0)     # (B, L, F)
    pos = jnp.arange(text_with_sos.shape[1])[None, :]              # (1, L)
    mask = (pos < text_length[:, None]).astype(jnp.float32)        # (B, L)
    summed = jnp.sum(emb * mask[:, :, None], axis=1)
    denom = jnp.maximum(jnp.sum(mask, axis=1, keepdims=True), 1.0)
    return summed / denom                                          # (B, F)


def image_encoder(params, image, encoded_text):
    """Global average pool (NCHW) + linear, conditioned on the text features."""
    pooled = jnp.mean(image, axis=(2, 3))                          # (B, 3)
    return pooled @ params["w_img"] + encoded_text @ params["w_cross"]


# ------------------------------ full forward ---------------------------------
@functools.partial(jax.jit)
def similarity_forward(params, context, text, text_length, image):
    batch_size = context.shape[0]
    sos = jnp.full((batch_size, 1), SOS_ID, dtype=text.dtype)
    text = jnp.concatenate((sos, text), axis=1)
    text_length = text_length + 1

    encoded_text = text_encoder(params, text, text_length)          # (B, TEXT_FEAT)
    encoded_image = image_encoder(params, image, encoded_text)      # (B, IMAGE_FEAT)

    # concat is free in XLA; the kernel then does a single K=64 MXU matmul.
    mm_in = jnp.concatenate(
        (encoded_text.astype(jnp.float32), encoded_image.astype(jnp.float32)),
        axis=1,
    )                                                               # (B, MM_SIZE)

    return similarity_head(
        context.astype(jnp.float32),
        mm_in,
        params["w_linear"],
        params["b_linear"],
    )


# ------------------------------- params --------------------------------------
def init_params(key):
    keys = jax.random.split(key, 6)
    scale = 0.05
    # nn.Linear(mm_size, ctx_size): stored as (in=mm_size, out=ctx_size).
    # (If porting real PyTorch weights, transpose the (out, in) tensor first.)
    w_linear = scale * jax.random.normal(keys[0], (MM_SIZE, CTX_SIZE), jnp.float32)
    return {
        "embedding": scale * jax.random.normal(keys[1], (VOCAB_SIZE, TEXT_FEAT), jnp.float32),
        "w_img": scale * jax.random.normal(keys[2], (3, IMAGE_FEAT), jnp.float32),
        "w_cross": scale * jax.random.normal(keys[3], (TEXT_FEAT, IMAGE_FEAT), jnp.float32),
        "w_linear": w_linear,
        "b_linear": (scale * jax.random.normal(keys[4], (CTX_SIZE,), jnp.float32)).reshape(1, CTX_SIZE),
    }


# --------------------------------- main ---------------------------------------
if __name__ == "__main__":
    key = jax.random.PRNGKey(0)
    k_ctx, k_txt, k_len, k_img, k_par = jax.random.split(key, 5)

    params = init_params(k_par)

    context = jax.random.normal(k_ctx, (BATCH, CTX_SIZE), jnp.float32)
    text = jax.random.randint(k_txt, (BATCH, TEXT_MAX_LEN), 2, VOCAB_SIZE, jnp.int32)
    text_length = jax.random.randint(k_len, (BATCH,), 1, TEXT_MAX_LEN + 1, jnp.int32)
    image = jax.random.normal(k_img, (BATCH, 3, IMAGE_SIZE, IMAGE_SIZE), jnp.float32)

    sim = similarity_forward(params, context, text, text_length, image)
    sim = jax.block_until_ready(sim)

    # reference check of the fused head (concat + linear + cosine sim) in plain JAX
    enc_t = text_encoder(params, jnp.concatenate(
        (jnp.full((BATCH, 1), SOS_ID, dtype=text.dtype), text), axis=1), text_length + 1)
    enc_i = image_encoder(params, image, enc_t)
    mm_ref = jnp.concatenate((enc_t, enc_i), axis=1) @ params["w_linear"] + params["b_linear"]
    num = jnp.sum(context * mm_ref, axis=-1)
    den = (jnp.maximum(jnp.linalg.norm(context, axis=-1), COS_EPS)
           * jnp.maximum(jnp.linalg.norm(mm_ref, axis=-1), COS_EPS))
    ref = num / den

    assert sim.shape == (BATCH,), sim.shape
    assert sim.dtype == jnp.float32
    assert bool(jnp.all(jnp.isfinite(sim)))
    assert bool(jnp.allclose(sim, ref, atol=1e-5, rtol=1e-5)), (sim, ref)
    print("KERNEL_OK")
</pallas_src>

<mosaic_0001>
module attributes {stable_mosaic.version = 11 : i64} {
  func.func @_similarity_kernel(%arg0: i32, %arg1: memref<8x32xf32, #tpu.memory_space<vmem>>, %arg2: memref<8x64xf32, #tpu.memory_space<vmem>>, %arg3: memref<64x32xf32, #tpu.memory_space<vmem>>, %arg4: memref<1x32xf32, #tpu.memory_space<vmem>>, %arg5: memref<8x128xf32, #tpu.memory_space<vmem>>) attributes {dimension_semantics = [#tpu.dimension_semantics<parallel>], iteration_bounds = array<i64: 1>, scalar_prefetch = 0 : i64, scratch_operands = 0 : i64, tpu.core_type = #tpu.core_type<tc>, window_params = [{transform_indices = @transform_0, window_bounds = array<i64: 8, 32>}, {transform_indices = @transform_1, window_bounds = array<i64: 8, 64>}, {pipeline_mode = #tpu.pipeline_mode<synchronous>, transform_indices = @transform_2, window_bounds = array<i64: 64, 32>}, {pipeline_mode = #tpu.pipeline_mode<synchronous>, transform_indices = @transform_3, window_bounds = array<i64: 1, 32>}, {transform_indices = @transform_4, window_bounds = array<i64: 8, 128>}]} {
    %c0 = arith.constant 0 : index
    %c0_0 = arith.constant 0 : index
    %0 = vector.load %arg2[%c0, %c0_0] : memref<8x64xf32, #tpu.memory_space<vmem>>, vector<8x64xf32>
    %c0_1 = arith.constant 0 : index
    %c0_2 = arith.constant 0 : index
    %1 = vector.load %arg3[%c0_1, %c0_2] : memref<64x32xf32, #tpu.memory_space<vmem>>, vector<64x32xf32>
    %cst = arith.constant dense<0.000000e+00> : vector<8x32xf32>
    %2 = tpu.matmul %0, %1, %cst {dimension_numbers = #tpu.dot_dimension_numbers<[1], [0], [0], [1], [0, 0, 1, 1], [], []>} : vector<8x64xf32>, vector<64x32xf32>, vector<8x32xf32> -> vector<8x32xf32>
    %c0_3 = arith.constant 0 : index
    %c0_4 = arith.constant 0 : index
    %3 = vector.load %arg4[%c0_3, %c0_4] : memref<1x32xf32, #tpu.memory_space<vmem>>, vector<1x32xf32>
    %4 = vector.broadcast %3 : vector<1x32xf32> to vector<8x32xf32>
    %5 = arith.addf %2, %4 : vector<8x32xf32>
    %c0_5 = arith.constant 0 : index
    %c0_6 = arith.constant 0 : index
    %6 = vector.load %arg1[%c0_5, %c0_6] : memref<8x32xf32, #tpu.memory_space<vmem>>, vector<8x32xf32>
    %7 = arith.mulf %6, %5 : vector<8x32xf32>
    %8 = arith.mulf %6, %6 : vector<8x32xf32>
    %9 = arith.mulf %5, %5 : vector<8x32xf32>
    %10 = tpu.concatenate %7, %8, %9 in 0 : vector<8x32xf32>, vector<8x32xf32>, vector<8x32xf32> -> vector<24x32xf32>
    %cst_7 = arith.constant dense<0.000000e+00> : vector<24xf32>
    %11 = vector.multi_reduction <add>, %10, %cst_7 [1] : vector<24x32xf32> to vector<24xf32>
    %12 = vector.shape_cast %11 : vector<24xf32> to vector<24x1xf32>
    %13 = vector.extract_strided_slice %12 {offsets = [0, 0], sizes = [8, 1], strides = [1, 1]} : vector<24x1xf32> to vector<8x1xf32>
    %14 = vector.extract_strided_slice %12 {offsets = [8, 0], sizes = [8, 1], strides = [1, 1]} : vector<24x1xf32> to vector<8x1xf32>
    %cst_8 = arith.constant 1.000000e-16 : f32
    %15 = vector.broadcast %cst_8 : f32 to vector<8x1xf32>
    %16 = arith.maximumf %14, %15 : vector<8x1xf32>
    %17 = vector.extract_strided_slice %12 {offsets = [16, 0], sizes = [8, 1], strides = [1, 1]} : vector<24x1xf32> to vector<8x1xf32>
    %cst_9 = arith.constant 1.000000e-16 : f32
    %18 = vector.broadcast %cst_9 : f32 to vector<8x1xf32>
    %19 = arith.maximumf %17, %18 : vector<8x1xf32>
    %20 = arith.mulf %16, %19 : vector<8x1xf32>
    %21 = math.rsqrt %20 : vector<8x1xf32>
    %22 = arith.mulf %13, %21 : vector<8x1xf32>
    %23 = vector.shape_cast %22 : vector<8x1xf32> to vector<8x1xf32>
    %24 = vector.broadcast %23 : vector<8x1xf32> to vector<8x128xf32>
    %c0_10 = arith.constant 0 : index
    %c0_11 = arith.constant 0 : index
    %25 = vector.load %arg5[%c0_10, %c0_11] : memref<8x128xf32, #tpu.memory_space<vmem>>, vector<8x128xf32>
    tpu.vector_store %arg5[%c0_10, %c0_11], %24 {strides = array<i32>} : memref<8x128xf32, #tpu.memory_space<vmem>>, vector<8x128xf32>,
    return
  }
  func.func @transform_0(%arg0: i32) -> (i32, i32) {
    %c0_i32 = arith.constant 0 : i32
    %c0_i32_0 = arith.constant 0 : i32
    return %arg0, %c0_i32 : i32, i32
  }
  func.func @transform_1(%arg0: i32) -> (i32, i32) {
    %c0_i32 = arith.constant 0 : i32
    %c0_i32_0 = arith.constant 0 : i32
    return %arg0, %c0_i32 : i32, i32
  }
  func.func @transform_2(%arg0: i32) -> (i32, i32) {
    %c0_i32 = arith.constant 0 : i32
    %c0_i32_0 = arith.constant 0 : i32
    %c0_i32_1 = arith.constant 0 : i32
    return %c0_i32, %c0_i32_0 : i32, i32
  }
  func.func @transform_3(%arg0: i32) -> (i32, i32) {
    %c0_i32 = arith.constant 0 : i32
    %c0_i32_0 = arith.constant 0 : i32
    %c0_i32_1 = arith.constant 0 : i32
    return %c0_i32, %c0_i32_0 : i32, i32
  }
  func.func @transform_4(%arg0: i32) -> (i32, i32) {
    %c0_i32 = arith.constant 0 : i32
    %c0_i32_0 = arith.constant 0 : i32
    return %arg0, %c0_i32 : i32, i32
  }
}

</mosaic_0001>

<bundles_post_ra>
// kernel: similarity_head.1
= control target key start
LH: loop header
LB: loop body
LE: loop exit
PB: predicated region body
PF: predicated region fallthrough
CT: control target
= control target key end

     0   :  { %v178_v0 = vmov 0.0|0.0   ;;  %vm179_vm0 = vmmov 0   ;;  %v180_v4 = vmov 0.0   ;;  %vm33_vm1 = vcmask 523264   ;;  %s242_s2 = inlined_call_operand.vmem [shape: f32[64,32], index: 2, kind: input, shape index: {}]   ;;  %s243_s1 = inlined_call_operand.vmem [shape: f32[8,64], index: 1, kind: input, shape index: {}]   ;;  %s244_s0 = inlined_call_operand.vmem [shape: f32[8,32], index: 0, kind: input, shape index: {}]   ;;  %s245_s3 = inlined_call_operand.vmem [shape: f32[1,32], index: 3, kind: input, shape index: {}]   ;;  %s246_s4 = inlined_call_operand.vmem [shape: f32[8,128], index: 4, kind: output, shape index: {}]  }
   0x1   :  { %161 = vmatprep.subr.bf16.mxu0 %v178_v0  ;;  %v18_v1 = vld [vmem:[%s242_s2] sm:$0xff]  ;;  %v19_v2 = vld [vmem:[%s242_s2 + $0x8] sm:$0xff]  ;;  %v20_v3 = vld [vmem:[%s242_s2 + $0x10] sm:$0xff]  ;;  %158 = vmatprep.mubr.msk.f32.mxu0 %vm179_vm0, %v180_v4  ;;  %vm111_vm2 = vcmask 261120  }
   0x2   :  { %v162_v5 = vpack.c.bf16 %v19_v2, %v18_v1  ;;  %v21_v6 = vld [vmem:[%s242_s2 + $0x18] sm:$0xff]  ;;  %v22_v8 = vld [vmem:[%s242_s2 + $0x20] sm:$0xff]  ;;  %v23_v9 = vld [vmem:[%s242_s2 + $0x28] sm:$0xff] }
   0x3   :  { %v165_v7 = vpack.c.bf16 %v21_v6, %v20_v3  ;;  %v168_v10 = vpack.c.bf16 %v23_v9, %v22_v8  ;;  %v24_v11 = vld [vmem:[%s242_s2 + $0x30] sm:$0xff]  ;;  %v25_v12 = vld [vmem:[%s242_s2 + $0x38] sm:$0xff]  ;;  %v17_v14 = vld [vmem:[%s243_s1] sm:$0xff] }
   0x4   :  { %163 = vmatpush3.bf16.msra.mxu0 %v162_v5  ;;  %v171_v13 = vpack.c.bf16 %v25_v12, %v24_v11  ;;  %v107_v15 = vld [vmem:[%s244_s0] sm:$0xff] }
   0x5   :  { %164 = vmatprep.subr.bf16.mxu0 %v178_v0  ;;  %v109_v16 = vmul.f32 %v107_v15, %v107_v15  ;;  %v131_v18 = vld [vmem:[%s245_s3] ss:$0 sm:$0xff] }
   0x7   :  { %v115_v17 = vsel %vm111_vm2, %v109_v16, 0.0 }
   0x8   :  { %166 = vmatpush3.bf16.msra.mxu0 %v165_v7  ;;  %116 = vadd.xlane.f32.xlu0 %v115_v17 }
   0x9   :  { %167 = vmatprep.subr.bf16.mxu0 %v178_v0 }
   0xc   :  { %169 = vmatpush3.bf16.msra.mxu0 %v168_v10 }
   0xd   :  { %170 = vmatprep.subr.bf16.mxu0 %v178_v0 }
  0x10   :  { %172 = vmatpush3.bf16.msra.mxu0 %v171_v13 }
  0x13   :  { %159 = vmatmul.mubr.msk.f32.vlgmr.msra.gmra.mrb[0].mxu0 %vm33_vm1, %v17_v14 }
  0x95   :  { %v117_v26 = vpop.xlane.xlu0 %116 }
  0x96   :  { %v121_v28 = vmax.f32 %v117_v26, 1e-16 }
  0xe6   :  { %v103_v19 = vpop.f32.mrb[0].mxu0 }
  0xe7   :  { %v104_v20 = vadd.f32 %v131_v18, %v103_v19  ;;  %v160_v21 = vpop.f32.mrb[1].mxu0 }
  0xe9   :  { %v110_v22 = vmul.f32 %v104_v20, %v104_v20  ;;  %v108_v23 = vmul.f32 %v107_v15, %v104_v20 }
  0xeb   :  { %v118_v24 = vsel %vm111_vm2, %v110_v22, 0.0  ;;  %v112_v25 = vsel %vm111_vm2, %v108_v23, 0.0 }
  0xec   :  { %119 = vadd.xlane.f32.xlu0 %v118_v24  ;;  %113 = vadd.xlane.f32.xlu1 %v112_v25 }
 0x179   :  { %v120_v27 = vpop.xlane.xlu0 %119  ;;  %v114_v32 = vpop.xlane.xlu1 %113 }
 0x17a   :  { %v122_v29 = vmax.f32 %v120_v27, 1e-16 }
 0x17c   :  { %v123_v30 = vmul.f32 %v122_v29, %v121_v28 }
 0x17e   :  { %176 = vrsqrt.f32 %v123_v30 }
 0x188   :  { %v177_v31 = vpop.eup %176 }
 0x189   :  { %v125_v33 = vmul.f32 %v177_v31, %v114_v32 }
 0x18b   :  { %126 = vst [vmem:[%s246_s4] sm:$0xff] %v125_v33 }

</bundles_post_ra>
